<compile_context>
chip_gen: v5e
topology: v5e:2x2
jax: 0.10.0
libtpu: 0.0.40
codegen_flags: <defaults>
</compile_context>

<pallas_src>
import functools

import jax
import jax.numpy as jnp
from jax.experimental import pallas as pl
from jax.experimental.pallas import tpu as pltpu  # noqa: F401  (TPU backend)


# ----------------------------------------------------------------------------
# Fused CCA kernel: both global-avg-pools, one fused gating matmul, sigmoid,
# per-channel scale and ReLU for the whole batch in a single invocation.
# ----------------------------------------------------------------------------
def _cca_kernel(x_ref, g_ref, w_ref, b_ref, o_ref, *, n, f_x, f_g):
    # x_ref : (N, F_x, HWx)   activations, spatial on the lane axis
    # g_ref : (N, F_g, HWg)
    # w_ref : (F_x, C_pad)    fused weight [0.5*W_x | 0.5*W_g | 0]
    # b_ref : (F_x, 1)        fused bias   0.5*(b_x + b_g)
    # o_ref : (N, F_x, HWx)
    x = x_ref[...].astype(jnp.float32)                 # upcast in-kernel (free VPU)
    g = g_ref[...].astype(jnp.float32)

    # Global average pools (cross-lane reduce on the XLU) -> per-batch columns.
    px = jnp.mean(x, axis=-1, keepdims=True)           # (N, F_x, 1)
    pg = jnp.mean(g, axis=-1, keepdims=True)           # (N, F_g, 1)

    # Build the (C_pad, N) pooled block: column n = [px_n ; pg_n ; 0...].
    c_pad = w_ref.shape[1]
    pad = c_pad - (f_x + f_g)
    cols = []
    for i in range(n):                                 # N is a small static int
        parts = [px[i], pg[i]]
        if pad > 0:
            parts.append(jnp.zeros((pad, 1), jnp.float32))
        cols.append(jnp.concatenate(parts, axis=0))    # (C_pad, 1)
    p = cols[0] if n == 1 else jnp.concatenate(cols, axis=1)   # (C_pad, N)

    # One MXU dot serves every batch element: z = [0.5Wx|0.5Wg] @ [px;pg] + b.
    z = jnp.dot(w_ref[...], p, preferred_element_type=jnp.float32) + b_ref[...]
    s = jax.nn.sigmoid(z)                              # (F_x, N) on the EUP

    # Per-channel gate broadcast over the spatial (lane) axis, then ReLU.
    for i in range(n):
        o_ref[i] = jnp.maximum(x[i] * s[:, i:i + 1], 0.0).astype(o_ref.dtype)


def cca_forward(g, x, params):
    """CCA forward. g: (N, F_g, Hg, Wg), x: (N, F_x, Hx, Wx)  (NCHW, as in PyTorch)."""
    w_x, b_x, w_g, b_g = params
    n, f_x, hx, wx_sp = x.shape
    _, f_g, hg, wg_sp = g.shape
    hw_x = hx * wx_sp
    hw_g = hg * wg_sp

    # No dtype casts on the big activations (a wrapper astype would double the
    # HBM read traffic); any upcast happens in-kernel after the load.
    x2 = x.reshape(n, f_x, hw_x)
    g2 = g.reshape(n, f_g, hw_g)

    # Fuse the two Linear layers:
    #   0.5*(Wx@px + bx + Wg@pg + bg) = [0.5Wx | 0.5Wg] @ [px; pg] + 0.5*(bx+bg)
    # zero-padded to a clean 128-wide contraction.
    c = f_x + f_g
    c_pad = ((c + 127) // 128) * 128
    w_fused = jnp.zeros((f_x, c_pad), jnp.float32)
    w_fused = w_fused.at[:, :f_x].set(0.5 * w_x.astype(jnp.float32))
    w_fused = w_fused.at[:, f_x:c].set(0.5 * w_g.astype(jnp.float32))
    b_fused = (0.5 * (b_x + b_g)).reshape(f_x, 1).astype(jnp.float32)

    bytes_x = x2.size * x2.dtype.itemsize
    bytes_g = g2.size * g2.dtype.itemsize
    bytes_w = (f_x * c_pad + f_x) * 4
    cost = pl.CostEstimate(
        flops=2 * n * f_x * c + 3 * n * f_x * hw_x + n * f_g * hw_g,
        transcendentals=n * f_x,
        bytes_accessed=2 * bytes_x + bytes_g + bytes_w,
    )

    kernel = functools.partial(_cca_kernel, n=n, f_x=f_x, f_g=f_g)

    out = pl.pallas_call(
        kernel,
        out_shape=jax.ShapeDtypeStruct((n, f_x, hw_x), x.dtype),
        # Single grid step: everything (~0.2 MiB) fits trivially in VMEM and
        # per-grid-step overhead dominates this kernel, so no grid at all.
        in_specs=[
            pl.BlockSpec((n, f_x, hw_x), lambda: (0, 0, 0)),
            pl.BlockSpec((n, f_g, hw_g), lambda: (0, 0, 0)),
            pl.BlockSpec((f_x, c_pad), lambda: (0, 0)),
            pl.BlockSpec((f_x, 1), lambda: (0, 0)),
        ],
        out_specs=pl.BlockSpec((n, f_x, hw_x), lambda: (0, 0, 0)),
        input_output_aliases={0: 0},     # donate x's HBM buffer to the output
        cost_estimate=cost,
    )(x2, g2, w_fused, b_fused)
    return out.reshape(n, f_x, hx, wx_sp)


# ----------------------------------------------------------------------------
# Pure-JAX reference (matches the PyTorch forward exactly, inference mode).
# ----------------------------------------------------------------------------
def cca_reference(g, x, params):
    w_x, b_x, w_g, b_g = params
    px = jnp.mean(x, axis=(2, 3))                      # avg_pool2d over all spatial
    pg = jnp.mean(g, axis=(2, 3))
    ax = px @ w_x.T + b_x                              # mlp_x
    ag = pg @ w_g.T + b_g                              # mlp_g
    s = jax.nn.sigmoid(0.5 * (ax + ag))
    return jnp.maximum(x * s[:, :, None, None], 0.0)


# ----------------------------------------------------------------------------
if __name__ == "__main__":
    key = jax.random.PRNGKey(0)
    kg, kx, k1, k2, k3, k4 = jax.random.split(key, 6)

    # CCA(F_g=64, F_x=32): g has 64 channels, x has 32 channels.
    N, F_x, F_g = 2, 32, 64
    Hx, Wx, Hg, Wg = 16, 16, 8, 8

    x = jax.random.normal(kx, (N, F_x, Hx, Wx), jnp.float32)
    g = jax.random.normal(kg, (N, F_g, Hg, Wg), jnp.float32)

    w_x = 0.1 * jax.random.normal(k1, (F_x, F_x), jnp.float32)   # Linear(F_x, F_x)
    b_x = 0.1 * jax.random.normal(k2, (F_x,), jnp.float32)
    w_g = 0.1 * jax.random.normal(k3, (F_x, F_g), jnp.float32)   # Linear(F_g, F_x)
    b_g = 0.1 * jax.random.normal(k4, (F_x,), jnp.float32)
    params = (w_x, b_x, w_g, b_g)

    out = jax.jit(cca_forward)(g, x, params)
    out = jax.block_until_ready(out)

    ref = cca_reference(g, x, params)
    assert out.shape == x.shape
    assert jnp.allclose(out, ref, atol=1e-5, rtol=1e-5)
    print("KERNEL_OK")
</pallas_src>

<mosaic_0001>
module attributes {stable_mosaic.version = 11 : i64} {
  func.func @_cca_kernel(%arg0: memref<2x32x256xf32, #tpu.memory_space<vmem>>, %arg1: memref<2x64x64xf32, #tpu.memory_space<vmem>>, %arg2: memref<32x128xf32, #tpu.memory_space<vmem>>, %arg3: memref<32x1xf32, #tpu.memory_space<vmem>>, %arg4: memref<2x32x256xf32, #tpu.memory_space<vmem>>) attributes {dimension_semantics = [], scalar_prefetch = 0 : i64, scratch_operands = 0 : i64, tpu.core_type = #tpu.core_type<tc>} {
    %c0 = arith.constant 0 : index
    %c0_0 = arith.constant 0 : index
    %c0_1 = arith.constant 0 : index
    %0 = vector.load %arg0[%c0, %c0_0, %c0_1] : memref<2x32x256xf32, #tpu.memory_space<vmem>>, vector<2x32x256xf32>
    %c0_2 = arith.constant 0 : index
    %c0_3 = arith.constant 0 : index
    %c0_4 = arith.constant 0 : index
    %1 = vector.load %arg1[%c0_2, %c0_3, %c0_4] : memref<2x64x64xf32, #tpu.memory_space<vmem>>, vector<2x64x64xf32>
    %cst = arith.constant dense<0.000000e+00> : vector<2x32xf32>
    %2 = vector.multi_reduction <add>, %0, %cst [2] : vector<2x32x256xf32> to vector<2x32xf32>
    %3 = vector.shape_cast %2 : vector<2x32xf32> to vector<2x32x1xf32>
    %cst_5 = arith.constant 2.560000e+02 : f32
    %4 = vector.broadcast %cst_5 : f32 to vector<2x32x1xf32>
    %5 = arith.divf %3, %4 : vector<2x32x1xf32>
    %cst_6 = arith.constant dense<0.000000e+00> : vector<2x64xf32>
    %6 = vector.multi_reduction <add>, %1, %cst_6 [2] : vector<2x64x64xf32> to vector<2x64xf32>
    %7 = vector.shape_cast %6 : vector<2x64xf32> to vector<2x64x1xf32>
    %cst_7 = arith.constant 6.400000e+01 : f32
    %8 = vector.broadcast %cst_7 : f32 to vector<2x64x1xf32>
    %9 = arith.divf %7, %8 : vector<2x64x1xf32>
    %10 = vector.extract_strided_slice %5 {offsets = [0, 0, 0], sizes = [1, 32, 1], strides = [1, 1, 1]} : vector<2x32x1xf32> to vector<1x32x1xf32>
    %11 = vector.shape_cast %10 : vector<1x32x1xf32> to vector<32x1xf32>
    %12 = vector.extract_strided_slice %9 {offsets = [0, 0, 0], sizes = [1, 64, 1], strides = [1, 1, 1]} : vector<2x64x1xf32> to vector<1x64x1xf32>
    %13 = vector.shape_cast %12 : vector<1x64x1xf32> to vector<64x1xf32>
    %cst_8 = arith.constant 0.000000e+00 : f32
    %14 = vector.broadcast %cst_8 : f32 to vector<32x1xf32>
    %15 = tpu.concatenate %11, %13, %14 in 0 : vector<32x1xf32>, vector<64x1xf32>, vector<32x1xf32> -> vector<128x1xf32>
    %16 = vector.extract_strided_slice %5 {offsets = [1, 0, 0], sizes = [1, 32, 1], strides = [1, 1, 1]} : vector<2x32x1xf32> to vector<1x32x1xf32>
    %17 = vector.shape_cast %16 : vector<1x32x1xf32> to vector<32x1xf32>
    %18 = vector.extract_strided_slice %9 {offsets = [1, 0, 0], sizes = [1, 64, 1], strides = [1, 1, 1]} : vector<2x64x1xf32> to vector<1x64x1xf32>
    %19 = vector.shape_cast %18 : vector<1x64x1xf32> to vector<64x1xf32>
    %cst_9 = arith.constant 0.000000e+00 : f32
    %20 = vector.broadcast %cst_9 : f32 to vector<32x1xf32>
    %21 = tpu.concatenate %17, %19, %20 in 0 : vector<32x1xf32>, vector<64x1xf32>, vector<32x1xf32> -> vector<128x1xf32>
    %22 = tpu.concatenate %15, %21 in 1 : vector<128x1xf32>, vector<128x1xf32> -> vector<128x2xf32>
    %c0_10 = arith.constant 0 : index
    %c0_11 = arith.constant 0 : index
    %23 = vector.load %arg2[%c0_10, %c0_11] : memref<32x128xf32, #tpu.memory_space<vmem>>, vector<32x128xf32>
    %cst_12 = arith.constant dense<0.000000e+00> : vector<32x2xf32>
    %24 = tpu.matmul %23, %22, %cst_12 {dimension_numbers = #tpu.dot_dimension_numbers<[1], [0], [0], [1], [0, 0, 1, 1], [], []>} : vector<32x128xf32>, vector<128x2xf32>, vector<32x2xf32> -> vector<32x2xf32>
    %c0_13 = arith.constant 0 : index
    %c0_14 = arith.constant 0 : index
    %25 = vector.load %arg3[%c0_13, %c0_14] : memref<32x1xf32, #tpu.memory_space<vmem>>, vector<32x1xf32>
    %26 = vector.broadcast %25 : vector<32x1xf32> to vector<32x2xf32>
    %27 = arith.addf %24, %26 : vector<32x2xf32>
    %28 = arith.negf %27 : vector<32x2xf32>
    %29 = math.exp %28 : vector<32x2xf32>
    %cst_15 = arith.constant 1.000000e+00 : f32
    %30 = vector.broadcast %cst_15 : f32 to vector<32x2xf32>
    %31 = arith.addf %30, %29 : vector<32x2xf32>
    %32 = arith.divf %30, %31 : vector<32x2xf32>
    %33 = vector.extract_strided_slice %0 {offsets = [0, 0, 0], sizes = [1, 32, 256], strides = [1, 1, 1]} : vector<2x32x256xf32> to vector<1x32x256xf32>
    %34 = vector.shape_cast %33 : vector<1x32x256xf32> to vector<32x256xf32>
    %35 = vector.extract_strided_slice %32 {offsets = [0, 0], sizes = [32, 1], strides = [1, 1]} : vector<32x2xf32> to vector<32x1xf32>
    %36 = vector.broadcast %35 : vector<32x1xf32> to vector<32x256xf32>
    %37 = arith.mulf %34, %36 : vector<32x256xf32>
    %cst_16 = arith.constant 0.000000e+00 : f32
    %38 = vector.broadcast %cst_16 : f32 to vector<32x256xf32>
    %39 = arith.maximumf %37, %38 : vector<32x256xf32>
    %c0_17 = arith.constant 0 : index
    %c0_18 = arith.constant 0 : index
    %c0_19 = arith.constant 0 : index
    %40 = vector.load %arg4[%c0_17, %c0_18, %c0_19] : memref<2x32x256xf32, #tpu.memory_space<vmem>>, vector<1x32x256xf32>
    %41 = vector.shape_cast %40 : vector<1x32x256xf32> to vector<32x256xf32>
    %42 = vector.shape_cast %39 : vector<32x256xf32> to vector<1x32x256xf32>
    tpu.vector_store %arg4[%c0_17, %c0_18, %c0_19], %42 {strides = array<i32>} : memref<2x32x256xf32, #tpu.memory_space<vmem>>, vector<1x32x256xf32>,
    %43 = vector.extract_strided_slice %0 {offsets = [1, 0, 0], sizes = [1, 32, 256], strides = [1, 1, 1]} : vector<2x32x256xf32> to vector<1x32x256xf32>
    %44 = vector.shape_cast %43 : vector<1x32x256xf32> to vector<32x256xf32>
    %45 = vector.extract_strided_slice %32 {offsets = [0, 1], sizes = [32, 1], strides = [1, 1]} : vector<32x2xf32> to vector<32x1xf32>
    %46 = vector.broadcast %45 : vector<32x1xf32> to vector<32x256xf32>
    %47 = arith.mulf %44, %46 : vector<32x256xf32>
    %cst_20 = arith.constant 0.000000e+00 : f32
    %48 = vector.broadcast %cst_20 : f32 to vector<32x256xf32>
    %49 = arith.maximumf %47, %48 : vector<32x256xf32>
    %c1 = arith.constant 1 : index
    %c0_21 = arith.constant 0 : index
    %c0_22 = arith.constant 0 : index
    %50 = vector.load %arg4[%c1, %c0_21, %c0_22] : memref<2x32x256xf32, #tpu.memory_space<vmem>>, vector<1x32x256xf32>
    %51 = vector.shape_cast %50 : vector<1x32x256xf32> to vector<32x256xf32>
    %52 = vector.shape_cast %49 : vector<32x256xf32> to vector<1x32x256xf32>
    tpu.vector_store %arg4[%c1, %c0_21, %c0_22], %52 {strides = array<i32>} : memref<2x32x256xf32, #tpu.memory_space<vmem>>, vector<1x32x256xf32>,
    return
  }
}

</mosaic_0001>

<bundles_post_ra>
// kernel: cca_forward.1
= control target key start
LH: loop header
LB: loop body
LE: loop exit
PB: predicated region body
PF: predicated region fallthrough
CT: control target
= control target key end

     0   :  { %vm88_vm0 = vcmask 523264   ;;  %v582_v40 = vmov 64.0   ;;  %v583_v45 = vmov 256.0   ;;  %v584_v54 = vmov 0.0   ;;  %s585_s7 = smov 1   ;;  %s962_s1 = inlined_call_operand.vmem [shape: f32[2,64,64], index: 1, kind: input, shape index: {}]   ;;  %s963_s0 = inlined_call_operand.vmem [shape: f32[2,32,256], index: 0, kind: input, shape index: {}, may-alias: {0,4}]   ;;  %s964_s3 = inlined_call_operand.vmem [shape: f32[32,1], index: 3, kind: input, shape index: {}]   ;;  %s965_s2 = inlined_call_operand.vmem [shape: f32[32,128], index: 2, kind: input, shape index: {}]   ;;  %s966_s4 = inlined_call_operand.vmem [shape: f32[2,32,256], index: 4, kind: output, shape index: {}, may-alias: {0,4}]  }
   0x1   :  { %v48_v0 = vld [vmem:[%s962_s1 + $0x78] sm:$0xff]  ;;  %v46_v1 = vld [vmem:[%s962_s1 + $0x68] sm:$0xff]  ;;  %v47_v6 = vld [vmem:[%s962_s1 + $0x70] sm:$0xff]  ;;  %562 = vrcp.f32 %v582_v40  ;;  %vm212_vm3 = vcmask 7168  }
   0x2   :  { %v134_v2 = vsel %vm88_vm0, %v48_v0, 0.0  ;;  %v128_v3 = vsel %vm88_vm0, %v46_v1, 0.0  ;;  %v44_v4 = vld [vmem:[%s962_s1 + $0x58] sm:$0xff]  ;;  %v45_v7 = vld [vmem:[%s962_s1 + $0x60] sm:$0xff]  ;;  %v43_v8 = vld [vmem:[%s962_s1 + $0x50] sm:$0xff]  ;;  %v131_v9 = vsel %vm88_vm0, %v47_v6, 0.0  ;;  %564 = vrcp.f32 %v583_v45 }
   0x3   :  { %135 = vadd.xlane.f32.xlu0 %v134_v2  ;;  %129 = vadd.xlane.f32.xlu1 %v128_v3  ;;  %v122_v5 = vsel %vm88_vm0, %v44_v4, 0.0  ;;  %v125_v10 = vsel %vm88_vm0, %v45_v7, 0.0  ;;  %v119_v11 = vsel %vm88_vm0, %v43_v8, 0.0  ;;  %v42_v12 = vld [vmem:[%s962_s1 + $0x48] sm:$0xff]  ;;  %v41_v13 = vld [vmem:[%s962_s1 + $0x40] sm:$0xff]  ;;  %v646_v14 = vld [vmem:[%s963_s0 + $0x70] sm:$0xff] }
   0x4   :  { %123 = vadd.xlane.f32.xlu2 %v122_v5  ;;  %v651_v15 = vld [vmem:[%s963_s0 + $0x78] sm:$0xff]  ;;  %v116_v16 = vsel %vm88_vm0, %v42_v12, 0.0  ;;  %v113_v17 = vsel %vm88_vm0, %v41_v13, 0.0  ;;  %v660_v19 = vld [vmem:[%s963_s0 + $0x60] sm:$0xff]  ;;  %v665_v20 = vld [vmem:[%s963_s0 + $0x68] sm:$0xff] }
   0x5   :  { %v70_v18 = vadd.f32 %v651_v15, %v646_v14  ;;  %v670_v21 = vld [vmem:[%s963_s0 + $0x50] sm:$0xff]  ;;  %v675_v22 = vld [vmem:[%s963_s0 + $0x58] sm:$0xff]  ;;  %v680_v23 = vld [vmem:[%s963_s0 + $0x40] sm:$0xff]  ;;  %v67_v25 = vadd.f32 %v665_v20, %v660_v19 }
   0x6   :  { %v685_v24 = vld [vmem:[%s963_s0 + $0x48] sm:$0xff]  ;;  %v64_v26 = vadd.f32 %v675_v22, %v670_v21  ;;  %v40_v28 = vld [vmem:[%s962_s1 + $0x38] sm:$0xff]  ;;  %v39_v30 = vld [vmem:[%s962_s1 + $0x30] sm:$0xff] }
   0x7   :  { %v61_v27 = vadd.f32 %v685_v24, %v680_v23  ;;  %v36_v29 = vld [vmem:[%s962_s1 + $0x18] sm:$0xff]  ;;  %v110_v31 = vsel %vm88_vm0, %v40_v28, 0.0  ;;  %v107_v33 = vsel %vm88_vm0, %v39_v30, 0.0  ;;  %v38_v34 = vld [vmem:[%s962_s1 + $0x28] sm:$0xff]  ;;  %v35_v35 = vld [vmem:[%s962_s1 + $0x10] sm:$0xff]  ;;  %v563_v41 = vpop.eup %562 }
   0x8   :  { %v98_v32 = vsel %vm88_vm0, %v36_v29, 0.0  ;;  %v104_v36 = vsel %vm88_vm0, %v38_v34, 0.0  ;;  %v95_v37 = vsel %vm88_vm0, %v35_v35, 0.0  ;;  %v37_v38 = vld [vmem:[%s962_s1 + $0x20] sm:$0xff]  ;;  %v138_v42 = vmul.f32 64.0, %v563_v41  ;;  %v565_v48 = vpop.eup %564  ;;  %v763_v30 = vld [vmem:[%s963_s0 + $0x28] sm:$0xff]  ;;  %vm797_vm4 = vmneg %vm212_vm3 }
   0x9   :  { %v101_v39 = vsel %vm88_vm0, %v37_v38, 0.0  ;;  %vm142_vm1 = vweird.f32 %v563_v41  ;;  %v74_v53 = vmul.f32 256.0, %v565_v48  ;;  %vm78_vm2 = vweird.f32 %v565_v48  ;;  %v758_v29 = vld [vmem:[%s963_s0 + $0x20] sm:$0xff]  ;;  %v787_v38 = vld [vmem:[%s963_s0 + $0x8] sm:$0xff] }
   0xa   :  { %v139_v43 = vsub.f32 1.0, %v138_v42 }
   0xb   :  { %132 = vadd.xlane.f32.xlu0 %v131_v9  ;;  %126 = vadd.xlane.f32.xlu1 %v125_v10  ;;  %v75_v56 = vsub.f32 1.0, %v74_v53 }
   0xc   :  { %120 = vadd.xlane.f32.xlu2 %v119_v11  ;;  %v140_v44 = vmul.f32 %v563_v41, %v139_v43 }
   0xd   :  { %v76_v0 = vmul.f32 %v565_v48, %v75_v56 }
   0xe   :  { %v141_v46 = vadd.f32 %v563_v41, %v140_v44 }
   0xf   :  { %v77_v3 = vadd.f32 %v565_v48, %v76_v0 }
  0x10   :  { %v717_v47 = vsel %vm142_vm1, %v563_v41, %v141_v46 }
  0x11   :  { %v729_v8 = vsel %vm78_vm2, %v565_v48, %v77_v3 }
  0x13   :  { %117 = vadd.xlane.f32.xlu0 %v116_v16  ;;  %114 = vadd.xlane.f32.xlu1 %v113_v17  ;;  %v33_v16 = vld [vmem:[%s962_s1] sm:$0xff]  ;;  %v34_v17 = vld [vmem:[%s962_s1 + $0x8] sm:$0xff] }
  0x14   :  { %71 = vadd.xlane.f32.xlu2 %v70_v18  ;;  %v89_v18 = vsel %vm88_vm0, %v33_v16, 0.0 }
  0x1b   :  { %68 = vadd.xlane.f32.xlu0 %v67_v25  ;;  %65 = vadd.xlane.f32.xlu1 %v64_v26  ;;  %v92_v25 = vsel %vm88_vm0, %v34_v17, 0.0  ;;  %v746_v26 = vld [vmem:[%s963_s0 + $0x30] sm:$0xff] }
  0x1c   :  { %62 = vadd.xlane.f32.xlu2 %v61_v27  ;;  %v751_v27 = vld [vmem:[%s963_s0 + $0x38] sm:$0xff] }
  0x1d   :  { %v58_v28 = vadd.f32 %v751_v27, %v746_v26 }
  0x23   :  { %111 = vadd.xlane.f32.xlu1 %v110_v31  ;;  %99 = vadd.xlane.f32.xlu0 %v98_v32  ;;  %v768_v31 = vld [vmem:[%s963_s0 + $0x10] sm:$0xff]  ;;  %v773_v32 = vld [vmem:[%s963_s0 + $0x18] sm:$0xff] }
  0x24   :  { %108 = vadd.xlane.f32.xlu2 %v107_v33  ;;  %v55_v33 = vadd.f32 %v763_v30, %v758_v29  ;;  %v52_v34 = vadd.f32 %v773_v32, %v768_v31 }
  0x2b   :  { %105 = vadd.xlane.f32.xlu1 %v104_v36 }
  0x2c   :  { %96 = vadd.xlane.f32.xlu2 %v95_v37  ;;  %v782_v37 = vld [vmem:[%s963_s0] sm:$0xff] }
  0x2d   :  { %v49_v41 = vadd.f32 %v787_v38, %v782_v37 }
  0x33   :  { %102 = vadd.xlane.f32.xlu1 %v101_v39 }
  0x76   :  { %v136_v49 = vpop.xlane.xlu0 %135  ;;  %v130_v50 = vpop.xlane.xlu1 %129 }
  0x77   :  { %v159_v51 = vmul.f32 %v717_v47, %v136_v49  ;;  %v124_v52 = vpop.xlane.xlu2 %123  ;;  %v157_v60 = vmul.f32 %v717_v47, %v130_v50 }
  0x78   :  { %v155_v57 = vmul.f32 %v717_v47, %v124_v52 }
  0x79   :  { %v522_v55 = vpack.i.bf16 %v159_v51, %v584_v54 }
  0x7b   :  { %523 = vrot.lane.b32.xlu0 %v522_v55, %s585_s7 }
  0x7e   :  { %v133_v58 = vpop.xlane.xlu0 %132  ;;  %v127_v59 = vpop.xlane.xlu1 %126 }
  0x7f   :  { %v158_v61 = vmul.f32 %v717_v47, %v133_v58  ;;  %v156_v62 = vmul.f32 %v717_v47, %v127_v59  ;;  %v121_v63 = vpop.xlane.xlu2 %120 }
  0x80   :  { %v154_v4 = vmul.f32 %v717_v47, %v121_v63 }
  0x81   :  { %v527_v1 = vpack.i.bf16 %v157_v60, %v158_v61  ;;  %v532_v2 = vpack.i.bf16 %v155_v57, %v156_v62 }
  0x83   :  { %533 = vrot.lane.b32.xlu1 %v532_v2, %s585_s7  ;;  %528 = vrot.lane.b32.xlu2 %v527_v1, %s585_s7 }
  0x86   :  { %v118_v5 = vpop.xlane.xlu0 %117  ;;  %v115_v7 = vpop.xlane.xlu1 %114 }
  0x87   :  { %v153_v6 = vmul.f32 %v717_v47, %v118_v5  ;;  %v72_v9 = vpop.xlane.xlu2 %71  ;;  %v152_v11 = vmul.f32 %v717_v47, %v115_v7 }
  0x88   :  { %v87_v12 = vmul.f32 %v729_v8, %v72_v9 }
  0x89   :  { %v537_v10 = vpack.i.bf16 %v153_v6, %v154_v4 }
  0x8a   :  { %v542_v13 = vpack.i.bf16 %v87_v12, %v152_v11 }
  0x8b   :  { %538 = vrot.lane.b32.xlu0 %v537_v10, %s585_s7 }
  0x8e   :  { %v69_v35 = vpop.xlane.xlu0 %68  ;;  %v66_v36 = vpop.xlane.xlu1 %65 }
  0x8f   :  { %v86_v39 = vmul.f32 %v729_v8, %v69_v35  ;;  %v85_v40 = vmul.f32 %v729_v8, %v66_v36  ;;  %v63_v43 = vpop.xlane.xlu2 %62  ;;  %v230_v36 = vld [vmem:[%s964_s3] sm:$0xff] }
  0x90   :  { %v84_v44 = vmul.f32 %v729_v8, %v63_v43 }
  0x91   :  { %v547_v42 = vpack.i.bf16 %v85_v40, %v86_v39  ;;  %v233_v39 = vld [vmem:[%s964_s3 + $0x18] sm:$0xff] }
  0x93   :  { %543 = vrot.lane.b32.xlu0 %v542_v13, %s585_s7 }
  0x96   :  { %v112_v45 = vpop.xlane.xlu1 %111  ;;  %v100_v48 = vpop.xlane.xlu0 %99 }
  0x97   :  { %v109_v46 = vpop.xlane.xlu2 %108  ;;  %v151_v57 = vmul.f32 %v717_v47, %v112_v45  ;;  %v147_v5 = vmul.f32 %v717_v47, %v100_v48  ;;  %v231_v45 = vld [vmem:[%s964_s3 + $0x8] sm:$0xff] }
  0x98   :  { %v150_v60 = vmul.f32 %v717_v47, %v109_v46 }
  0x9e   :  { %v106_v49 = vpop.xlane.xlu1 %105 }
  0x9f   :  { %v97_v50 = vpop.xlane.xlu2 %96  ;;  %v149_v63 = vmul.f32 %v717_v47, %v106_v49 }
  0xa0   :  { %v146_v9 = vmul.f32 %v717_v47, %v97_v50 }
  0xa6   :  { %v103_v53 = vpop.xlane.xlu1 %102 }
  0xa7   :  { %v148_v2 = vmul.f32 %v717_v47, %v103_v53 }
  0xac   :  { %90 = vadd.xlane.f32.xlu2 %v89_v18 }
  0xad   :  { %93 = vadd.xlane.f32.xlu1 %v92_v25 }
  0xb4   :  { %59 = vadd.xlane.f32.xlu2 %v58_v28 }
  0xbc   :  { %56 = vadd.xlane.f32.xlu2 %v55_v33 }
  0xbd   :  { %53 = vadd.xlane.f32.xlu0 %v52_v34 }
  0xc4   :  { %50 = vadd.xlane.f32.xlu2 %v49_v41 }
  0xc6   :  { %548 = vrot.lane.b32.xlu1 %v547_v42, %s585_s7  ;;  %v586_v42 = vmov 0  }
  0xc7   :  { %552 = vset.pattern.permute.xlu1 %v586_v42  ;;  %554 = vset.pattern.permute.xlu0 %v586_v42 }
  0xc8   :  { %553 = vset.pattern.permute.xlu2 %v586_v42 }
  0xce   :  { %236 = vperm.xlu1 %552, %v230_v36  }
  0xd1   :  { %251 = vperm.xlu0 %554, %v233_v39  }
  0xd6   :  { %241 = vperm.xlu1 %552, %v231_v45  }
  0xdc   :  { %173 = vrot.lane.b32.xlu2 %v84_v44, %s585_s7  ;;  %v232_v44 = vld [vmem:[%s964_s3 + $0x10] sm:$0xff] }
  0xdd   :  { %v529_v55 = vpop.permute.xlu2 %528 }
  0xde   :  { %v530_v58 = vunpack.i.l.bf16 %v529_v55  ;;  %v531_v61 = vunpack.i.h.bf16 %v529_v55 }
  0xe0   :  { %v223_v1 = vsel %vm212_vm3, %v150_v60, %v530_v58  ;;  %v222_v4 = vsel %vm212_vm3, %v149_v63, %v531_v61  ;;  %v226_v60 = vld [vmem:[%s965_s2] sm:$0xff]  ;;  %v227_v61 = vld [vmem:[%s965_s2 + $0x8] sm:$0xff] }
  0xe4   :  { %246 = vperm.xlu2 %553, %v232_v44  }
  0xed   :  { %v524_v51 = vpop.permute.xlu0 %523 }
  0xee   :  { %v525_v54 = vunpack.i.l.bf16 %v524_v51  ;;  %v526_v56 = vunpack.i.h.bf16 %v524_v51 }
  0xf0   :  { %449 = vmatpush.msk.msra.mxu0 %vm797_vm4, %v525_v54  ;;  %468 = vmatpush.msk.msra.mxu1 %vm797_vm4, %v525_v54  ;;  %v224_v62 = vsel %vm212_vm3, %v151_v57, %v526_v56 }
  0xf1   :  { %469 = vmatpush.msk.msra.mxu2 %vm797_vm4, %v525_v54  ;;  %470 = vmatpush.msk.msra.mxu3 %vm797_vm4, %v525_v54 }
  0xf2   :  { %451 = vmatpush.msk.msra.mxu0 %vm797_vm4, %v525_v54  ;;  %471 = vmatpush.msk.msra.mxu1 %vm797_vm4, %v525_v54 }
  0xf3   :  { %472 = vmatpush.msk.msra.mxu2 %vm797_vm4, %v525_v54  ;;  %473 = vmatpush.msk.msra.mxu3 %vm797_vm4, %v525_v54 }
  0xf4   :  { %453 = vmatpush.msk.msra.mxu0 %vm797_vm4, %v525_v54  ;;  %474 = vmatpush.msk.msra.mxu1 %vm797_vm4, %v525_v54 }
  0xf5   :  { %475 = vmatpush.msk.msra.mxu2 %vm797_vm4, %v525_v54  ;;  %476 = vmatpush.msk.msra.mxu3 %vm797_vm4, %v525_v54  ;;  %v534_v59 = vpop.permute.xlu1 %533 }
  0xf6   :  { %455 = vmatpush.msk.msra.mxu0 %vm797_vm4, %v525_v54  ;;  %477 = vmatpush.msk.msra.mxu1 %vm797_vm4, %v525_v54  ;;  %v535_v0 = vunpack.i.l.bf16 %v534_v59  ;;  %v536_v3 = vunpack.i.h.bf16 %v534_v59 }
  0xf7   :  { %478 = vmatpush.msk.msra.mxu2 %vm797_vm4, %v525_v54  ;;  %479 = vmatpush.msk.msra.mxu3 %vm797_vm4, %v525_v54 }
  0xf8   :  { %258 = vmatpush.msra.mxu0 %v224_v62  ;;  %480 = vmatpush.msra.mxu1 %v224_v62  ;;  %v221_v7 = vsel %vm212_vm3, %v148_v2, %v535_v0  ;;  %v220_v11 = vsel %vm212_vm3, %v147_v5, %v536_v3  ;;  %v587_v5 = vmov 1  }
  0xf9   :  { %481 = vmatpush.msra.mxu2 %v224_v62  ;;  %482 = vmatpush.msra.mxu3 %v224_v62  ;;  %v229_v62 = vld [vmem:[%s965_s2 + $0x18] sm:$0xff] }
  0xfa   :  { %259 = vmatpush.msra.mxu0 %v223_v1  ;;  %483 = vmatpush.msra.mxu1 %v223_v1 }
  0xfb   :  { %484 = vmatpush.msra.mxu2 %v223_v1  ;;  %485 = vmatpush.msra.mxu3 %v223_v1 }
  0xfc   :  { %260 = vmatpush.msra.mxu0 %v222_v4  ;;  %486 = vmatpush.msra.mxu1 %v222_v4 }
  0xfd   :  { %487 = vmatpush.msra.mxu2 %v222_v4  ;;  %488 = vmatpush.msra.mxu3 %v222_v4  ;;  %v539_v6 = vpop.permute.xlu0 %538 }
  0xfe   :  { %v540_v10 = vunpack.i.l.bf16 %v539_v6  ;;  %261 = vmatpush.msra.mxu0 %v221_v7  ;;  %489 = vmatpush.msra.mxu1 %v221_v7  ;;  %v541_v18 = vunpack.i.h.bf16 %v539_v6 }
  0xff   :  { %490 = vmatpush.msra.mxu2 %v221_v7  ;;  %491 = vmatpush.msra.mxu3 %v221_v7 }
 0x100   :  { %262 = vmatpush.msra.mxu0 %v220_v11  ;;  %492 = vmatpush.msra.mxu1 %v220_v11  ;;  %v219_v12 = vsel %vm212_vm3, %v146_v9, %v540_v10 }
 0x101   :  { %493 = vmatpush.msra.mxu2 %v220_v11  ;;  %494 = vmatpush.msra.mxu3 %v220_v11 }
 0x102   :  { %263 = vmatpush.msra.mxu0 %v219_v12  ;;  %495 = vmatpush.msra.mxu1 %v219_v12 }
 0x103   :  { %496 = vmatpush.msra.mxu2 %v219_v12  ;;  %497 = vmatpush.msra.mxu3 %v219_v12 }
 0x104   :  { %561 = vset.pattern.permute.xlu0 %v587_v5 }
 0x105   :  { %v544_v16 = vpop.permute.xlu0 %543 }
 0x106   :  { %v545_v33 = vunpack.i.l.bf16 %v544_v16  ;;  %v546_v40 = vunpack.i.h.bf16 %v544_v16 }
 0x11f   :  { %v91_v13 = vpop.xlane.xlu2 %90 }
 0x120   :  { %v94_v17 = vpop.xlane.xlu1 %93  ;;  %v144_v25 = vmul.f32 %v717_v47, %v91_v13 }
 0x121   :  { %v145_v28 = vmul.f32 %v717_v47, %v94_v17 }
 0x122   :  { %v217_v35 = vsel %vm212_vm3, %v144_v25, %v545_v33 }
 0x123   :  { %v218_v34 = vsel %vm212_vm3, %v145_v28, %v541_v18 }
 0x124   :  { %264 = vmatpush.msra.mxu0 %v218_v34  ;;  %498 = vmatpush.msra.mxu1 %v218_v34 }
 0x125   :  { %499 = vmatpush.msra.mxu2 %v218_v34  ;;  %500 = vmatpush.msra.mxu3 %v218_v34 }
 0x126   :  { %265 = vmatpush.msra.mxu0 %v217_v35  ;;  %501 = vmatpush.msra.mxu1 %v217_v35 }
 0x127   :  { %502 = vmatpush.msra.mxu2 %v217_v35  ;;  %503 = vmatpush.msra.mxu3 %v217_v35  ;;  %v60_v47 = vpop.xlane.xlu2 %59 }
 0x128   :  { %v83_v41 = vmul.f32 %v729_v8, %v60_v47 }
 0x12a   :  { %v216_v43 = vsel %vm212_vm3, %v83_v41, %v546_v40 }
 0x12b   :  { %266 = vmatpush.msra.mxu0 %v216_v43  ;;  %504 = vmatpush.msra.mxu1 %v216_v43 }
 0x12c   :  { %505 = vmatpush.msra.mxu2 %v216_v43  ;;  %506 = vmatpush.msra.mxu3 %v216_v43 }
 0x12f   :  { %v57_v46 = vpop.xlane.xlu2 %56 }
 0x130   :  { %v54_v48 = vpop.xlane.xlu0 %53  ;;  %v82_v52 = vmul.f32 %v729_v8, %v57_v46 }
 0x131   :  { %v81_v50 = vmul.f32 %v729_v8, %v54_v48 }
 0x137   :  { %v51_v49 = vpop.xlane.xlu2 %50 }
 0x138   :  { %v549_v51 = vpop.permute.xlu1 %548  ;;  %v80_v57 = vmul.f32 %v729_v8, %v51_v49  ;;  %v228_v8 = vld [vmem:[%s965_s2 + $0x10] sm:$0xff] }
 0x139   :  { %v551_v53 = vunpack.i.h.bf16 %v549_v51  ;;  %v550_v54 = vunpack.i.l.bf16 %v549_v51 }
 0x13b   :  { %v215_v55 = vsel %vm212_vm3, %v82_v52, %v550_v54  ;;  %v214_v56 = vsel %vm212_vm3, %v81_v50, %v551_v53 }
 0x13c   :  { %267 = vmatpush.msra.mxu0 %v215_v55  ;;  %507 = vmatpush.msra.mxu1 %v215_v55 }
 0x13d   :  { %508 = vmatpush.msra.mxu2 %v215_v55  ;;  %509 = vmatpush.msra.mxu3 %v215_v55 }
 0x13e   :  { %268 = vmatpush.msra.mxu0 %v214_v56  ;;  %510 = vmatpush.msra.mxu1 %v214_v56 }
 0x13f   :  { %511 = vmatpush.msra.mxu2 %v214_v56  ;;  %512 = vmatpush.msra.mxu3 %v214_v56  ;;  %v174_v58 = vpop.permute.xlu2 %173 }
 0x140   :  { %v213_v59 = vsel %vm212_vm3, %v80_v57, %v174_v58  ;;  %v237_v63 = vpop.permute.xlu1 %236 }
 0x141   :  { %269 = vmatpush.msra.mxu0 %v213_v59  ;;  %513 = vmatpush.msra.mxu1 %v213_v59 }
 0x142   :  { %514 = vmatpush.msra.mxu2 %v213_v59  ;;  %515 = vmatpush.msra.mxu3 %v213_v59 }
 0x143   :  { %270 = vmatmul.f32.vlgmr.msra.gmra.mxu0 %v226_v60  ;;  %273 = vmatmul.f32.vlgmr.msra.gmra.mxu1 %v227_v61  ;;  %v252_v10 = vpop.permute.xlu0 %251 }
 0x144   :  { %276 = vmatmul.f32.vlgmr.msra.gmra.mxu2 %v228_v8  ;;  %279 = vmatmul.f32.vlgmr.msra.gmra.mxu3 %v229_v62 }
 0x147   :  { %v247_v9 = vpop.permute.xlu2 %246 }
 0x148   :  { %v242_v0 = vpop.permute.xlu1 %241 }
 0x1c0   :  { %v271_v1 = vpop.f32.mrf.mxu0  ;;  %v274_v2 = vpop.f32.mrf.mxu1 }
 0x1c1   :  { %v272_v3 = vadd.f32 %v271_v1, %v237_v63  ;;  %v275_v4 = vadd.f32 %v274_v2, %v242_v0 }
 0x1c3   :  { %v456_v6 = vmul.f32 -1.442695, %v272_v3  ;;  %v457_v7 = vmul.f32 -1.442695, %v275_v4 }
 0x1c5   :  { %566 = vpow2.f32 %v456_v6 }
 0x1c6   :  { %568 = vpow2.f32 %v457_v7 }
 0x1c7   :  { %v277_v11 = vpop.f32.mrf.mxu2  ;;  %v280_v12 = vpop.f32.mrf.mxu3 }
 0x1c8   :  { %v278_v13 = vadd.f32 %v277_v11, %v247_v9  ;;  %v281_v16 = vadd.f32 %v280_v12, %v252_v10 }
 0x1ca   :  { %v458_v17 = vmul.f32 -1.442695, %v278_v13  ;;  %v459_v18 = vmul.f32 -1.442695, %v281_v16 }
 0x1cb   :  { %v567_v25 = vpop.eup %566 }
 0x1cc   :  { %v569_v28 = vpop.eup %568  ;;  %v295_v33 = vadd.f32 1.0, %v567_v25  ;;  %570 = vpow2.f32 %v458_v17 }
 0x1cd   :  { %v296_v34 = vadd.f32 1.0, %v569_v28  ;;  %572 = vpow2.f32 %v459_v18 }
 0x1ce   :  { %574 = vrcp.f32 %v295_v33  ;;  %v308_v48 = vand.u32 2147483647, %v295_v33  ;;  %v310_v49 = vand.u32 2147483648, %v295_v33  ;;  %vm304_vm7 = vweird.f32 %v295_v33 }
 0x1cf   :  { %576 = vrcp.f32 %v296_v34  ;;  %v325_v50 = vand.u32 2147483648, %v296_v34  ;;  %v323_v53 = vand.u32 2147483647, %v296_v34  ;;  %vm319_vm8 = vweird.f32 %v296_v34 }
 0x1d0   :  { %vm309_vm10 = vcmp.eq.f32.partialorder %v308_v48, 8.507059e+37  ;;  %v311_v58 = vor.u32 1.1754944e-38, %v310_v49 }
 0x1d1   :  { %v326_v59 = vor.u32 1.1754944e-38, %v325_v50  ;;  %vm324_vm12 = vcmp.eq.f32.partialorder %v323_v53, 8.507059e+37 }
 0x1d2   :  { %v571_v35 = vpop.eup %570 }
 0x1d3   :  { %v573_v36 = vpop.eup %572  ;;  %v885_v39 = vadd.f32 1.0, %v571_v35 }
 0x1d4   :  { %v575_v47 = vpop.eup %574  ;;  %v298_v40 = vadd.f32 1.0, %v573_v36 }
 0x1d5   :  { %v577_v41 = vpop.eup %576  ;;  %578 = vrcp.f32 %v885_v39  ;;  %v300_v43 = vmul.f32 %v575_v47, %v295_v33  ;;  %vm305_vm5 = vweird.f32 %v575_v47  ;;  %vm334_vm15 = vweird.f32 %v885_v39 }
 0x1d6   :  { %580 = vrcp.f32 %v298_v40  ;;  %v315_v44 = vmul.f32 %v577_v41, %v296_v34  ;;  %vm320_vm6 = vweird.f32 %v577_v41  ;;  %vm306_vm9 = vmor %vm304_vm7, %vm305_vm5  ;;  %vm349_vm13 = vweird.f32 %v298_v40 }
 0x1d7   :  { %v301_v45 = vsub.f32 1.0, %v300_v43  ;;  %vm321_vm11 = vmor %vm319_vm8, %vm320_vm6  ;;  %v355_v6 = vand.u32 2147483648, %v298_v40  ;;  %v340_v7 = vand.u32 2147483648, %v885_v39  ;;  %v353_v10 = vand.u32 2147483647, %v298_v40 }
 0x1d8   :  { %v316_v46 = vsub.f32 1.0, %v315_v44  ;;  %v338_v12 = vand.u32 2147483647, %v885_v39 }
 0x1d9   :  { %v302_v51 = vmul.f32 %v575_v47, %v301_v45  ;;  %v356_v13 = vor.u32 1.1754944e-38, %v355_v6  ;;  %v341_v16 = vor.u32 1.1754944e-38, %v340_v7  ;;  %vm354_vm3 = vcmp.eq.f32.partialorder %v353_v10, 8.507059e+37 }
 0x1da   :  { %v317_v52 = vmul.f32 %v577_v41, %v316_v46  ;;  %vm339_vm4 = vcmp.eq.f32.partialorder %v338_v12, 8.507059e+37 }
 0x1db   :  { %v579_v54 = vpop.eup %578  ;;  %v303_v55 = vadd.f32 %v575_v47, %v302_v51 }
 0x1dc   :  { %v581_v56 = vpop.eup %580  ;;  %v318_v57 = vadd.f32 %v577_v41, %v317_v52  ;;  %v330_v61 = vmul.f32 %v579_v54, %v885_v39  ;;  %vm335_vm0 = vweird.f32 %v579_v54 }
 0x1dd   :  { %v307_v60 = vsel %vm306_vm9, %v575_v47, %v303_v55  ;;  %v345_v8 = vmul.f32 %v581_v56, %v298_v40  ;;  %vm350_vm14 = vweird.f32 %v581_v56  ;;  %vm336_vm2 = vmor %vm334_vm15, %vm335_vm0 }
 0x1de   :  { %v322_v62 = vsel %vm321_vm11, %v577_v41, %v318_v57  ;;  %v312_v63 = vsel %vm309_vm10, %v311_v58, %v307_v60  ;;  %v331_v2 = vsub.f32 1.0, %v330_v61  ;;  %vm351_vm1 = vmor %vm349_vm13, %vm350_vm14 }
 0x1df   :  { %v327_v0 = vsel %vm324_vm12, %v326_v59, %v322_v62  ;;  %361 = vperm.xlu1 %552, %v312_v63   ;;  %v346_v1 = vsub.f32 1.0, %v345_v8 }
 0x1e0   :  { %366 = vperm.xlu2 %553, %v327_v0   ;;  %v332_v4 = vmul.f32 %v579_v54, %v331_v2 }
 0x1e1   :  { %v347_v3 = vmul.f32 %v581_v56, %v346_v1 }
 0x1e2   :  { %v333_v11 = vadd.f32 %v579_v54, %v332_v4 }
 0x1e3   :  { %v348_v9 = vadd.f32 %v581_v56, %v347_v3 }
 0x1e4   :  { %v337_v18 = vsel %vm336_vm2, %v579_v54, %v333_v11 }
 0x1e5   :  { %v352_v17 = vsel %vm351_vm1, %v581_v56, %v348_v9  ;;  %v342_v28 = vsel %vm339_vm4, %v341_v16, %v337_v18 }
 0x1e6   :  { %v357_v25 = vsel %vm354_vm3, %v356_v13, %v352_v17 }
 0x1e7   :  { %555 = vset.pattern.permute.xlu1 %v587_v5 }
 0x1e8   :  { %556 = vset.pattern.permute.xlu2 %v587_v5  ;;  %404 = vperm.xlu1 %555, %v312_v63  }
 0x1e9   :  { %408 = vperm.xlu2 %556, %v327_v0  }
 0x1f0   :  { %557 = vset.pattern.permute.xlu1 %v586_v42 }
 0x1f1   :  { %371 = vperm.xlu1 %557, %v342_v28   ;;  %558 = vset.pattern.permute.xlu2 %v586_v42 }
 0x1f2   :  { %376 = vperm.xlu2 %558, %v357_v25  }
 0x1f9   :  { %559 = vset.pattern.permute.xlu1 %v587_v5 }
 0x1fa   :  { %412 = vperm.xlu1 %559, %v342_v28   ;;  %560 = vset.pattern.permute.xlu2 %v587_v5 }
 0x1fb   :  { %416 = vperm.xlu2 %560, %v357_v25  }
 0x23a   :  { %v367_v33 = vpop.permute.xlu2 %366 }
 0x23b   :  { %v381_v34 = vmul.f32 %v367_v33, %v768_v31  ;;  %v382_v35 = vmul.f32 %v367_v33, %v773_v32 }
 0x23d   :  { %v389_v36 = vmax.f32 %v381_v34, 0.0  ;;  %v390_v39 = vmax.f32 %v382_v35, 0.0 }
 0x23f   :  { %397 = vst [vmem:[%s966_s4 + $0x10] sm:$0xff] %v389_v36 }
 0x240   :  { %398 = vst [vmem:[%s966_s4 + $0x18] sm:$0xff] %v390_v39 }
 0x243   :  { %v409_v42 = vpop.permute.xlu2 %408 }
 0x244   :  { %v421_v47 = vmul.f32 %v409_v42, %v670_v21  ;;  %v422_v5 = vmul.f32 %v409_v42, %v675_v22 }
 0x246   :  { %v429_v40 = vmax.f32 %v421_v47, 0.0  ;;  %v430_v41 = vmax.f32 %v422_v5, 0.0 }
 0x248   :  { %462 = vst [vmem:[%s966_s4 + $0x50] sm:$0xff] %v429_v40 }
 0x249   :  { %463 = vst [vmem:[%s966_s4 + $0x58] sm:$0xff] %v430_v41 }
 0x24c   :  { %v377_v31 = vpop.permute.xlu2 %376 }
 0x24d   :  { %v385_v32 = vmul.f32 %v377_v31, %v746_v26  ;;  %v386_v43 = vmul.f32 %v377_v31, %v751_v27 }
 0x24f   :  { %v393_v44 = vmax.f32 %v385_v32, 0.0  ;;  %v394_v45 = vmax.f32 %v386_v43, 0.0 }
 0x251   :  { %401 = vst [vmem:[%s966_s4 + $0x30] sm:$0xff] %v393_v44  ;;  %v362_v21 = vpop.permute.xlu1 %361 }
 0x252   :  { %402 = vst [vmem:[%s966_s4 + $0x38] sm:$0xff] %v394_v45  ;;  %v379_v22 = vmul.f32 %v362_v21, %v782_v37  ;;  %v380_v46 = vmul.f32 %v362_v21, %v787_v38 }
 0x254   :  { %v387_v48 = vmax.f32 %v379_v22, 0.0  ;;  %v388_v49 = vmax.f32 %v380_v46, 0.0 }
 0x255   :  { %v417_v26 = vpop.permute.xlu2 %416 }
 0x256   :  { %395 = vst [vmem:[%s966_s4] sm:$0xff] %v387_v48  ;;  %v425_v27 = vmul.f32 %v417_v26, %v646_v14  ;;  %v426_v50 = vmul.f32 %v417_v26, %v651_v15 }
 0x257   :  { %396 = vst [vmem:[%s966_s4 + $0x8] sm:$0xff] %v388_v49 }
 0x258   :  { %v433_v51 = vmax.f32 %v425_v27, 0.0  ;;  %v434_v52 = vmax.f32 %v426_v50, 0.0 }
 0x25a   :  { %466 = vst [vmem:[%s966_s4 + $0x70] sm:$0xff] %v433_v51  ;;  %v405_v37 = vpop.permute.xlu1 %404 }
 0x25b   :  { %467 = vst [vmem:[%s966_s4 + $0x78] sm:$0xff] %v434_v52  ;;  %v419_v38 = vmul.f32 %v405_v37, %v680_v23  ;;  %v420_v14 = vmul.f32 %v405_v37, %v685_v24 }
 0x25d   :  { %v427_v15 = vmax.f32 %v419_v38, 0.0  ;;  %v428_v53 = vmax.f32 %v420_v14, 0.0 }
 0x25f   :  { %460 = vst [vmem:[%s966_s4 + $0x40] sm:$0xff] %v427_v15 }
 0x260   :  { %461 = vst [vmem:[%s966_s4 + $0x48] sm:$0xff] %v428_v53 }
 0x263   :  { %v372_v54 = vpop.permute.xlu1 %371 }
 0x264   :  { %v383_v55 = vmul.f32 %v372_v54, %v758_v29  ;;  %v384_v56 = vmul.f32 %v372_v54, %v763_v30 }
 0x266   :  { %v391_v57 = vmax.f32 %v383_v55, 0.0  ;;  %v392_v58 = vmax.f32 %v384_v56, 0.0 }
 0x268   :  { %399 = vst [vmem:[%s966_s4 + $0x20] sm:$0xff] %v391_v57 }
 0x269   :  { %400 = vst [vmem:[%s966_s4 + $0x28] sm:$0xff] %v392_v58 }
 0x26c   :  { %v413_v23 = vpop.permute.xlu1 %412 }
 0x26d   :  { %v423_v24 = vmul.f32 %v413_v23, %v660_v19  ;;  %v424_v59 = vmul.f32 %v413_v23, %v665_v20 }
 0x26f   :  { %v431_v60 = vmax.f32 %v423_v24, 0.0  ;;  %v432_v61 = vmax.f32 %v424_v59, 0.0 }
 0x271   :  { %464 = vst [vmem:[%s966_s4 + $0x60] sm:$0xff] %v431_v60 }
 0x272   :  { %465 = vst [vmem:[%s966_s4 + $0x68] sm:$0xff] %v432_v61 }

</bundles_post_ra>
